<compile_context>
chip_gen: v6e
topology: v6e:2x2x1
jax: 0.10.0
libtpu: 0.0.40
codegen_flags: <defaults>
</compile_context>

<pallas_src>
import functools

import jax
import jax.numpy as jnp
from jax import lax
from jax.experimental import pallas as pl
from jax.experimental.pallas import tpu as pltpu

EPS = 1e-5
LEAKY_SLOPE = 0.2
K = 4        # conv kernel size
STRIDE = 2
PAD = 1

# (sub-pixel parity dy, coarse-grid shift si) -> ConvTranspose tap ky for
# kernel=4, stride=2, padding=1 (output row y = 2*i - 1 + ky, y = 2*a + dy
# reads input row i = a + si):  ky = -2*si + dy + 1
#   dy=0: (si=0 -> ky=1), (si=-1 -> ky=3)
#   dy=1: (si=+1 -> ky=0), (si=0 -> ky=2)
_TAP = {(0, 0): 1, (0, -1): 3, (1, 1): 0, (1, 0): 2}
_PARITIES = ((0, 0), (0, 1), (1, 0), (1, 1))       # (dy, dx), par = dy*2 + dx
_SHIFTS_FOR = {0: (0, -1), 1: (1, 0)}              # parity -> valid coarse shifts


# ------------------------------ fused kernel ------------------------------- #

def _unet_inner_kernel(p1_ref, wd_ref, wu_ref, gamma_ref, beta_ref, out_ref,
                       *, oh, ow, inv_count):
    m = p1_ref.shape[1]                                   # N*OH*OW (lane axis)

    # ---- down conv: one lane-dense bf16 MXU matmul (LeakyReLU pre-applied in
    # the wrapper on x before im2col; p1 already bf16), f32 accumulate + ReLU.
    d = jnp.dot(wd_ref[...], p1_ref[...],
                preferred_element_type=jnp.float32)       # (inner, M) f32
    d = jnp.maximum(d, 0.0)

    # ---- up conv: dilation-free sub-pixel ConvTranspose2d(4, 4, s=2, p=1).
    # Neighbour taps d[c, a+si, b+sj] are in-register XLU lane rolls of the
    # flat (inner, M) activation + a lane-validity mask (no halo scratch,
    # no zero-fill, no unaligned stores/loads).
    ow_bits = ow.bit_length() - 1                         # OH/OW powers of two
    lane = lax.broadcasted_iota(jnp.int32, (1, m), 1)     # m = n*OH*OW + a*OW + b
    b_idx = lane & (ow - 1)
    a_idx = (lane >> ow_bits) & (oh - 1)

    pieces = {}
    for si in (-1, 0, 1):
        for sj in (-1, 0, 1):
            delta = si * ow + sj
            shifted = d if delta == 0 else pltpu.roll(d, shift=(-delta) % m, axis=1)
            conds = []
            if si < 0:
                conds.append(a_idx >= -si)
            elif si > 0:
                conds.append(a_idx < oh - si)
            if sj < 0:
                conds.append(b_idx >= -sj)
            elif sj > 0:
                conds.append(b_idx < ow - sj)
            if conds:
                valid = functools.reduce(lambda a, b: a & b, conds)
                shifted = jnp.where(valid, shifted, 0.0)
            pieces[(si, sj)] = shifted

    # Per-parity matmuls: each (dy, dx) sub-pixel plane touches only 4 of the
    # 9 shifts -> no structural-zero MXU MACs (contraction 9*inner -> 4*inner).
    u_pars = []
    for par, (dy, dx) in enumerate(_PARITIES):
        dstack = jnp.concatenate(
            [pieces[(si, sj)] for si in _SHIFTS_FOR[dy] for sj in _SHIFTS_FOR[dx]],
            axis=0).astype(jnp.bfloat16)                  # (4*inner, M) bf16
        u_pars.append(jnp.dot(wu_ref[par], dstack,
                              preferred_element_type=jnp.float32))  # (outer, M)

    # ---- BatchNorm2d (training-mode batch stats), lane-first reduction:
    # per-parity lane sums (XLU) + a 4-term add give per-channel stats; the
    # normalization is a single FMA fused into the lane-dense writeback.
    mean = sum(jnp.sum(u, axis=1, keepdims=True) for u in u_pars) * inv_count
    cen = [u - mean for u in u_pars]
    var = sum(jnp.sum(c * c, axis=1, keepdims=True) for c in cen) * inv_count
    scale = gamma_ref[...] * lax.rsqrt(var + EPS)
    beta = beta_ref[...]
    out_ref[...] = jnp.concatenate([c * scale + beta for c in cen], axis=0)


# ------------------------------- JAX wrapper -------------------------------- #

def _im2col_t(x, k, stride, pad):
    """NCHW -> (C*k*k, N*OH*OW): channel/tap on sublanes, spatial on lanes."""
    n, c, h, w = x.shape
    oh = (h + 2 * pad - k) // stride + 1
    ow = (w + 2 * pad - k) // stride + 1
    xp = jnp.pad(x, ((0, 0), (0, 0), (pad, pad), (pad, pad)))
    taps = [xp[:, :, ky:ky + stride * oh:stride, kx:kx + stride * ow:stride]
            for ky in range(k) for kx in range(k)]
    p = jnp.stack(taps, axis=2)                            # (N, C, k*k, OH, OW)
    return p.transpose(1, 2, 0, 3, 4).reshape(c * k * k, n * oh * ow), oh, ow


def _subpixel_parity_weights(wu):
    """ConvTranspose2d weight (in, out, 4, 4) -> per-parity weights
    (4, out, 4*in); parity par = dy*2 + dx, columns q = shift_idx*in + c with
    shift order [(si, sj) for si in _SHIFTS_FOR[dy] for sj in _SHIFTS_FOR[dx]]."""
    pars = []
    for dy, dx in _PARITIES:
        blocks = []
        for si in _SHIFTS_FOR[dy]:
            for sj in _SHIFTS_FOR[dx]:
                ky, kx = _TAP[(dy, si)], _TAP[(dx, sj)]
                blocks.append(wu[:, :, ky, kx].T)          # (out, in)
        pars.append(jnp.concatenate(blocks, axis=1))       # (out, 4*in)
    return jnp.stack(pars, axis=0)                         # (4, out, 4*in)


def unet_innermost_block(x, params):
    """x: (N, outer_nc, H, W) -> (N, 2*outer_nc, H, W). Single fused Pallas call."""
    n, c_in, h, w = x.shape
    wd, wu = params["down_w"], params["up_w"]
    inner_nc, outer_nc = wd.shape[0], wu.shape[1]
    oh, ow = h // 2, w // 2
    m = n * oh * ow
    rows = 4 * outer_nc
    assert oh & (oh - 1) == 0 and ow & (ow - 1) == 0, "power-of-two spatial dims"
    # TODO(synk): for large N*OH*OW, tile the lane axis with a pl.cdiv grid
    # ("parallel" so v7x's two TensorCores both work), carry BN partial sums
    # across tiles, and/or set pipeline_mode=pl.Buffered(1) on the full-array
    # specs; at these shapes one VMEM-resident block is optimal.

    # One-time layout / parameter prep (tiny, XLA).  LeakyReLU is applied to x
    # BEFORE the 16x im2col expansion, and the patch matrix is bf16 (it is
    # bf16-rounded at the MXU anyway) -> half the DMA bytes for the big input.
    x_act = jnp.where(x >= 0.0, x, LEAKY_SLOPE * x).astype(jnp.bfloat16)
    p1t, _, _ = _im2col_t(x_act, K, STRIDE, PAD)                        # (C*16, M) bf16
    wd_flat = wd.reshape(inner_nc, c_in * K * K).astype(jnp.bfloat16)   # (inner, C*16)
    wu_pars = _subpixel_parity_weights(wu).astype(jnp.bfloat16)         # (4, out, 4*inner)
    gamma_c = params["gamma"].reshape(outer_nc, 1).astype(jnp.float32)
    beta_c = params["beta"].reshape(outer_nc, 1).astype(jnp.float32)

    # VMEM budget from actual residency (inputs double-buffered, plus f32
    # intermediates d / shifted pieces / u), clamped to v7x's 64 MiB physical.
    block_bytes = (2 * p1t.size * 2 + 2 * wd_flat.size * 2 + 2 * wu_pars.size * 2
                   + 2 * rows * m * 4 + 16 * inner_nc * m * 4 + 2 * rows * m * 4)
    vmem_limit = int(min(64 << 20, max(32 << 20, 2 * block_bytes)))

    kernel = functools.partial(_unet_inner_kernel, oh=oh, ow=ow,
                               inv_count=1.0 / float(n * h * w))
    u = pl.pallas_call(
        kernel,
        out_shape=jax.ShapeDtypeStruct((rows, m), jnp.float32),
        grid=(1,),
        in_specs=[pl.BlockSpec((c_in * K * K, m), lambda i: (0, 0)),
                  pl.BlockSpec((inner_nc, c_in * K * K), lambda i: (0, 0)),
                  pl.BlockSpec((4, outer_nc, 4 * inner_nc), lambda i: (0, 0, 0)),
                  pl.BlockSpec((outer_nc, 1), lambda i: (0, 0)),
                  pl.BlockSpec((outer_nc, 1), lambda i: (0, 0))],
        out_specs=pl.BlockSpec((rows, m), lambda i: (0, 0)),
        compiler_params=pltpu.CompilerParams(
            dimension_semantics=("arbitrary",),
            vmem_limit_bytes=vmem_limit),
    )(p1t, wd_flat, wu_pars, gamma_c, beta_c)

    # Epilogue: sub-pixel planes (dy, dx, o, n, a, b) -> NCHW, then skip concat.
    # TODO(synk): fold into the kernel via strided lane stores into an aliased
    # (N, 2*outer, H, W) slab (input_output_aliases) to kill this HBM round trip.
    un = u.reshape(2, 2, outer_nc, n, oh, ow).transpose(3, 2, 4, 0, 5, 1)
    un = un.reshape(n, outer_nc, h, w)
    return jnp.concatenate([x, un], axis=1)


# -------------------------------- reference --------------------------------- #

def reference(x, params):
    """Pure-XLA reference. Conv operands are bf16-rounded to mirror the kernel's
    bf16 MXU inputs (f32 everywhere else), so the comparison stays tight."""
    wd, wu = params["down_w"], params["up_w"]
    gamma, beta = params["gamma"], params["beta"]
    bf = lambda t: t.astype(jnp.bfloat16).astype(jnp.float32)
    h = jnp.where(x >= 0, x, LEAKY_SLOPE * x)
    d = lax.conv_general_dilated(bf(h), bf(wd), (2, 2), ((1, 1), (1, 1)),
                                 dimension_numbers=("NCHW", "OIHW", "NCHW"))
    r = jnp.maximum(d, 0.0)
    wc = jnp.flip(wu, axis=(2, 3)).transpose(1, 0, 2, 3)
    u = lax.conv_general_dilated(bf(r), bf(wc), (1, 1), ((2, 2), (2, 2)),
                                 lhs_dilation=(2, 2),
                                 dimension_numbers=("NCHW", "OIHW", "NCHW"))
    mean = u.mean(axis=(0, 2, 3), keepdims=True)
    var = u.var(axis=(0, 2, 3), keepdims=True)
    un = (u - mean) / jnp.sqrt(var + EPS)
    un = un * gamma.reshape(1, -1, 1, 1) + beta.reshape(1, -1, 1, 1)
    return jnp.concatenate([x, un], axis=1)


if __name__ == "__main__":
    key = jax.random.PRNGKey(0)
    k1, k2, k3, k4, kx = jax.random.split(key, 5)

    outer_nc, inner_nc = 4, 8
    N, H, W = 2, 16, 16

    params = {
        # Conv2d(input_nc=outer_nc, inner_nc, 4): (out, in, kH, kW)
        "down_w": 0.05 * jax.random.normal(k1, (inner_nc, outer_nc, K, K), jnp.float32),
        # ConvTranspose2d(inner_nc, outer_nc, 4): (in, out, kH, kW)
        "up_w":   0.05 * jax.random.normal(k2, (inner_nc, outer_nc, K, K), jnp.float32),
        # BatchNorm2d(outer_nc) affine params (non-trivial to exercise the path)
        "gamma":  1.0 + 0.1 * jax.random.normal(k3, (outer_nc,), jnp.float32),
        "beta":   0.1 * jax.random.normal(k4, (outer_nc,), jnp.float32),
    }
    x = jax.random.normal(kx, (N, outer_nc, H, W), jnp.float32)

    fwd = jax.jit(unet_innermost_block)
    out = jax.block_until_ready(fwd(x, params))
    ref = reference(x, params)

    assert out.shape == (N, 2 * outer_nc, H, W), out.shape
    err = float(jnp.max(jnp.abs(out - ref)))
    # Tolerance covers bf16 operand rounding of the intermediate activation
    # (independent accumulation order on the two sides can re-round relu(d) by
    # one bf16 ulp, which BatchNorm's 1/std then amplifies when var is small).
    assert jnp.allclose(out, ref, atol=2e-2, rtol=2e-2), err
    print("KERNEL_OK")
</pallas_src>

<mosaic_0001>
module attributes {stable_mosaic.version = 11 : i64} {
  func.func @_unet_inner_kernel(%arg0: i32, %arg1: memref<64x128xbf16, #tpu.memory_space<vmem>>, %arg2: memref<8x64xbf16, #tpu.memory_space<vmem>>, %arg3: memref<4x4x32xbf16, #tpu.memory_space<vmem>>, %arg4: memref<4x1xf32, #tpu.memory_space<vmem>>, %arg5: memref<4x1xf32, #tpu.memory_space<vmem>>, %arg6: memref<16x128xf32, #tpu.memory_space<vmem>>) attributes {dimension_semantics = [#tpu.dimension_semantics<arbitrary>], iteration_bounds = array<i64: 1>, scalar_prefetch = 0 : i64, scratch_operands = 0 : i64, tpu.core_type = #tpu.core_type<tc>, window_params = [{pipeline_mode = #tpu.pipeline_mode<synchronous>, transform_indices = @transform_0, window_bounds = array<i64: 64, 128>}, {pipeline_mode = #tpu.pipeline_mode<synchronous>, transform_indices = @transform_1, window_bounds = array<i64: 8, 64>}, {pipeline_mode = #tpu.pipeline_mode<synchronous>, transform_indices = @transform_2, window_bounds = array<i64: 4, 4, 32>}, {pipeline_mode = #tpu.pipeline_mode<synchronous>, transform_indices = @transform_3, window_bounds = array<i64: 4, 1>}, {pipeline_mode = #tpu.pipeline_mode<synchronous>, transform_indices = @transform_4, window_bounds = array<i64: 4, 1>}, {pipeline_mode = #tpu.pipeline_mode<synchronous>, transform_indices = @transform_5, window_bounds = array<i64: 16, 128>}]} {
    %c0 = arith.constant 0 : index
    %c0_0 = arith.constant 0 : index
    %0 = vector.load %arg2[%c0, %c0_0] : memref<8x64xbf16, #tpu.memory_space<vmem>>, vector<8x64xbf16>
    %c0_1 = arith.constant 0 : index
    %c0_2 = arith.constant 0 : index
    %1 = vector.load %arg1[%c0_1, %c0_2] : memref<64x128xbf16, #tpu.memory_space<vmem>>, vector<64x128xbf16>
    %cst = arith.constant dense<0.000000e+00> : vector<8x128xf32>
    %2 = tpu.matmul %0, %1, %cst {dimension_numbers = #tpu.dot_dimension_numbers<[1], [0], [0], [1], [0, 0, 1, 1], [], []>} : vector<8x64xbf16>, vector<64x128xbf16>, vector<8x128xf32> -> vector<8x128xf32>
    %cst_3 = arith.constant 0.000000e+00 : f32
    %3 = vector.broadcast %cst_3 : f32 to vector<8x128xf32>
    %4 = arith.maximumf %2, %3 : vector<8x128xf32>
    %5 = tpu.iota {dimensions = array<i32: 1>} : vector<1x128xi32>
    %c7_i32 = arith.constant 7 : i32
    %6 = vector.broadcast %c7_i32 : i32 to vector<1x128xi32>
    %7 = arith.andi %5, %6 : vector<1x128xi32>
    %c3_i32 = arith.constant 3 : i32
    %8 = vector.broadcast %c3_i32 : i32 to vector<1x128xi32>
    %9 = arith.shrsi %5, %8 : vector<1x128xi32>
    %c7_i32_4 = arith.constant 7 : i32
    %10 = vector.broadcast %c7_i32_4 : i32 to vector<1x128xi32>
    %11 = arith.andi %9, %10 : vector<1x128xi32>
    %c9_i32 = arith.constant 9 : i32
    %12 = tpu.dynamic_rotate %4 by %c9_i32 dim 1 : vector<8x128xf32>, i32 -> vector<8x128xf32>
    %c1_i32 = arith.constant 1 : i32
    %13 = vector.broadcast %c1_i32 : i32 to vector<1x128xi32>
    %14 = arith.cmpi sge, %11, %13 : vector<1x128xi32>
    %c1_i32_5 = arith.constant 1 : i32
    %15 = vector.broadcast %c1_i32_5 : i32 to vector<1x128xi32>
    %16 = arith.cmpi sge, %7, %15 : vector<1x128xi32>
    %17 = arith.andi %14, %16 : vector<1x128xi1>
    %cst_6 = arith.constant 0.000000e+00 : f32
    %18 = vector.shape_cast %17 : vector<1x128xi1> to vector<1x128xi1>
    %19 = vector.broadcast %18 : vector<1x128xi1> to vector<8x128xi1>
    %20 = vector.broadcast %cst_6 : f32 to vector<8x128xf32>
    %21 = arith.select %19, %12, %20 : vector<8x128xi1>, vector<8x128xf32>
    %c8_i32 = arith.constant 8 : i32
    %22 = tpu.dynamic_rotate %4 by %c8_i32 dim 1 : vector<8x128xf32>, i32 -> vector<8x128xf32>
    %c1_i32_7 = arith.constant 1 : i32
    %23 = vector.broadcast %c1_i32_7 : i32 to vector<1x128xi32>
    %24 = arith.cmpi sge, %11, %23 : vector<1x128xi32>
    %cst_8 = arith.constant 0.000000e+00 : f32
    %25 = vector.shape_cast %24 : vector<1x128xi1> to vector<1x128xi1>
    %26 = vector.broadcast %25 : vector<1x128xi1> to vector<8x128xi1>
    %27 = vector.broadcast %cst_8 : f32 to vector<8x128xf32>
    %28 = arith.select %26, %22, %27 : vector<8x128xi1>, vector<8x128xf32>
    %c7_i32_9 = arith.constant 7 : i32
    %29 = tpu.dynamic_rotate %4 by %c7_i32_9 dim 1 : vector<8x128xf32>, i32 -> vector<8x128xf32>
    %c1_i32_10 = arith.constant 1 : i32
    %30 = vector.broadcast %c1_i32_10 : i32 to vector<1x128xi32>
    %31 = arith.cmpi sge, %11, %30 : vector<1x128xi32>
    %c7_i32_11 = arith.constant 7 : i32
    %32 = vector.broadcast %c7_i32_11 : i32 to vector<1x128xi32>
    %33 = arith.cmpi slt, %7, %32 : vector<1x128xi32>
    %34 = arith.andi %31, %33 : vector<1x128xi1>
    %cst_12 = arith.constant 0.000000e+00 : f32
    %35 = vector.shape_cast %34 : vector<1x128xi1> to vector<1x128xi1>
    %36 = vector.broadcast %35 : vector<1x128xi1> to vector<8x128xi1>
    %37 = vector.broadcast %cst_12 : f32 to vector<8x128xf32>
    %38 = arith.select %36, %29, %37 : vector<8x128xi1>, vector<8x128xf32>
    %c1_i32_13 = arith.constant 1 : i32
    %39 = tpu.dynamic_rotate %4 by %c1_i32_13 dim 1 : vector<8x128xf32>, i32 -> vector<8x128xf32>
    %c1_i32_14 = arith.constant 1 : i32
    %40 = vector.broadcast %c1_i32_14 : i32 to vector<1x128xi32>
    %41 = arith.cmpi sge, %7, %40 : vector<1x128xi32>
    %cst_15 = arith.constant 0.000000e+00 : f32
    %42 = vector.shape_cast %41 : vector<1x128xi1> to vector<1x128xi1>
    %43 = vector.broadcast %42 : vector<1x128xi1> to vector<8x128xi1>
    %44 = vector.broadcast %cst_15 : f32 to vector<8x128xf32>
    %45 = arith.select %43, %39, %44 : vector<8x128xi1>, vector<8x128xf32>
    %c127_i32 = arith.constant 127 : i32
    %46 = tpu.dynamic_rotate %4 by %c127_i32 dim 1 : vector<8x128xf32>, i32 -> vector<8x128xf32>
    %c7_i32_16 = arith.constant 7 : i32
    %47 = vector.broadcast %c7_i32_16 : i32 to vector<1x128xi32>
    %48 = arith.cmpi slt, %7, %47 : vector<1x128xi32>
    %cst_17 = arith.constant 0.000000e+00 : f32
    %49 = vector.shape_cast %48 : vector<1x128xi1> to vector<1x128xi1>
    %50 = vector.broadcast %49 : vector<1x128xi1> to vector<8x128xi1>
    %51 = vector.broadcast %cst_17 : f32 to vector<8x128xf32>
    %52 = arith.select %50, %46, %51 : vector<8x128xi1>, vector<8x128xf32>
    %c121_i32 = arith.constant 121 : i32
    %53 = tpu.dynamic_rotate %4 by %c121_i32 dim 1 : vector<8x128xf32>, i32 -> vector<8x128xf32>
    %c7_i32_18 = arith.constant 7 : i32
    %54 = vector.broadcast %c7_i32_18 : i32 to vector<1x128xi32>
    %55 = arith.cmpi slt, %11, %54 : vector<1x128xi32>
    %c1_i32_19 = arith.constant 1 : i32
    %56 = vector.broadcast %c1_i32_19 : i32 to vector<1x128xi32>
    %57 = arith.cmpi sge, %7, %56 : vector<1x128xi32>
    %58 = arith.andi %55, %57 : vector<1x128xi1>
    %cst_20 = arith.constant 0.000000e+00 : f32
    %59 = vector.shape_cast %58 : vector<1x128xi1> to vector<1x128xi1>
    %60 = vector.broadcast %59 : vector<1x128xi1> to vector<8x128xi1>
    %61 = vector.broadcast %cst_20 : f32 to vector<8x128xf32>
    %62 = arith.select %60, %53, %61 : vector<8x128xi1>, vector<8x128xf32>
    %c120_i32 = arith.constant 120 : i32
    %63 = tpu.dynamic_rotate %4 by %c120_i32 dim 1 : vector<8x128xf32>, i32 -> vector<8x128xf32>
    %c7_i32_21 = arith.constant 7 : i32
    %64 = vector.broadcast %c7_i32_21 : i32 to vector<1x128xi32>
    %65 = arith.cmpi slt, %11, %64 : vector<1x128xi32>
    %cst_22 = arith.constant 0.000000e+00 : f32
    %66 = vector.shape_cast %65 : vector<1x128xi1> to vector<1x128xi1>
    %67 = vector.broadcast %66 : vector<1x128xi1> to vector<8x128xi1>
    %68 = vector.broadcast %cst_22 : f32 to vector<8x128xf32>
    %69 = arith.select %67, %63, %68 : vector<8x128xi1>, vector<8x128xf32>
    %c119_i32 = arith.constant 119 : i32
    %70 = tpu.dynamic_rotate %4 by %c119_i32 dim 1 : vector<8x128xf32>, i32 -> vector<8x128xf32>
    %c7_i32_23 = arith.constant 7 : i32
    %71 = vector.broadcast %c7_i32_23 : i32 to vector<1x128xi32>
    %72 = arith.cmpi slt, %11, %71 : vector<1x128xi32>
    %c7_i32_24 = arith.constant 7 : i32
    %73 = vector.broadcast %c7_i32_24 : i32 to vector<1x128xi32>
    %74 = arith.cmpi slt, %7, %73 : vector<1x128xi32>
    %75 = arith.andi %72, %74 : vector<1x128xi1>
    %cst_25 = arith.constant 0.000000e+00 : f32
    %76 = vector.shape_cast %75 : vector<1x128xi1> to vector<1x128xi1>
    %77 = vector.broadcast %76 : vector<1x128xi1> to vector<8x128xi1>
    %78 = vector.broadcast %cst_25 : f32 to vector<8x128xf32>
    %79 = arith.select %77, %70, %78 : vector<8x128xi1>, vector<8x128xf32>
    %80 = tpu.concatenate %4, %45, %28, %21 in 0 : vector<8x128xf32>, vector<8x128xf32>, vector<8x128xf32>, vector<8x128xf32> -> vector<32x128xf32>
    %81 = arith.truncf %80 : vector<32x128xf32> to vector<32x128xbf16>
    %c0_26 = arith.constant 0 : index
    %c0_27 = arith.constant 0 : index
    %c0_28 = arith.constant 0 : index
    %82 = vector.load %arg3[%c0_26, %c0_27, %c0_28] : memref<4x4x32xbf16, #tpu.memory_space<vmem>>, vector<1x4x32xbf16>
    %83 = vector.shape_cast %82 : vector<1x4x32xbf16> to vector<4x32xbf16>
    %cst_29 = arith.constant dense<0.000000e+00> : vector<4x128xf32>
    %84 = tpu.matmul %83, %81, %cst_29 {dimension_numbers = #tpu.dot_dimension_numbers<[1], [0], [0], [1], [0, 0, 1, 1], [], []>} : vector<4x32xbf16>, vector<32x128xbf16>, vector<4x128xf32> -> vector<4x128xf32>
    %85 = tpu.concatenate %52, %4, %38, %28 in 0 : vector<8x128xf32>, vector<8x128xf32>, vector<8x128xf32>, vector<8x128xf32> -> vector<32x128xf32>
    %86 = arith.truncf %85 : vector<32x128xf32> to vector<32x128xbf16>
    %c1 = arith.constant 1 : index
    %c0_30 = arith.constant 0 : index
    %c0_31 = arith.constant 0 : index
    %87 = vector.load %arg3[%c1, %c0_30, %c0_31] : memref<4x4x32xbf16, #tpu.memory_space<vmem>>, vector<1x4x32xbf16>
    %88 = vector.shape_cast %87 : vector<1x4x32xbf16> to vector<4x32xbf16>
    %cst_32 = arith.constant dense<0.000000e+00> : vector<4x128xf32>
    %89 = tpu.matmul %88, %86, %cst_32 {dimension_numbers = #tpu.dot_dimension_numbers<[1], [0], [0], [1], [0, 0, 1, 1], [], []>} : vector<4x32xbf16>, vector<32x128xbf16>, vector<4x128xf32> -> vector<4x128xf32>
    %90 = tpu.concatenate %69, %62, %4, %45 in 0 : vector<8x128xf32>, vector<8x128xf32>, vector<8x128xf32>, vector<8x128xf32> -> vector<32x128xf32>
    %91 = arith.truncf %90 : vector<32x128xf32> to vector<32x128xbf16>
    %c2 = arith.constant 2 : index
    %c0_33 = arith.constant 0 : index
    %c0_34 = arith.constant 0 : index
    %92 = vector.load %arg3[%c2, %c0_33, %c0_34] : memref<4x4x32xbf16, #tpu.memory_space<vmem>>, vector<1x4x32xbf16>
    %93 = vector.shape_cast %92 : vector<1x4x32xbf16> to vector<4x32xbf16>
    %cst_35 = arith.constant dense<0.000000e+00> : vector<4x128xf32>
    %94 = tpu.matmul %93, %91, %cst_35 {dimension_numbers = #tpu.dot_dimension_numbers<[1], [0], [0], [1], [0, 0, 1, 1], [], []>} : vector<4x32xbf16>, vector<32x128xbf16>, vector<4x128xf32> -> vector<4x128xf32>
    %95 = tpu.concatenate %79, %69, %52, %4 in 0 : vector<8x128xf32>, vector<8x128xf32>, vector<8x128xf32>, vector<8x128xf32> -> vector<32x128xf32>
    %96 = arith.truncf %95 : vector<32x128xf32> to vector<32x128xbf16>
    %c3 = arith.constant 3 : index
    %c0_36 = arith.constant 0 : index
    %c0_37 = arith.constant 0 : index
    %97 = vector.load %arg3[%c3, %c0_36, %c0_37] : memref<4x4x32xbf16, #tpu.memory_space<vmem>>, vector<1x4x32xbf16>
    %98 = vector.shape_cast %97 : vector<1x4x32xbf16> to vector<4x32xbf16>
    %cst_38 = arith.constant dense<0.000000e+00> : vector<4x128xf32>
    %99 = tpu.matmul %98, %96, %cst_38 {dimension_numbers = #tpu.dot_dimension_numbers<[1], [0], [0], [1], [0, 0, 1, 1], [], []>} : vector<4x32xbf16>, vector<32x128xbf16>, vector<4x128xf32> -> vector<4x128xf32>
    %cst_39 = arith.constant dense<0.000000e+00> : vector<4xf32>
    %100 = vector.multi_reduction <add>, %84, %cst_39 [1] : vector<4x128xf32> to vector<4xf32>
    %101 = vector.shape_cast %100 : vector<4xf32> to vector<4x1xf32>
    %cst_40 = arith.constant 0.000000e+00 : f32
    %102 = vector.broadcast %cst_40 : f32 to vector<4x1xf32>
    %103 = arith.addf %102, %101 : vector<4x1xf32>
    %cst_41 = arith.constant dense<0.000000e+00> : vector<4xf32>
    %104 = vector.multi_reduction <add>, %89, %cst_41 [1] : vector<4x128xf32> to vector<4xf32>
    %105 = vector.shape_cast %104 : vector<4xf32> to vector<4x1xf32>
    %106 = arith.addf %103, %105 : vector<4x1xf32>
    %cst_42 = arith.constant dense<0.000000e+00> : vector<4xf32>
    %107 = vector.multi_reduction <add>, %94, %cst_42 [1] : vector<4x128xf32> to vector<4xf32>
    %108 = vector.shape_cast %107 : vector<4xf32> to vector<4x1xf32>
    %109 = arith.addf %106, %108 : vector<4x1xf32>
    %cst_43 = arith.constant dense<0.000000e+00> : vector<4xf32>
    %110 = vector.multi_reduction <add>, %99, %cst_43 [1] : vector<4x128xf32> to vector<4xf32>
    %111 = vector.shape_cast %110 : vector<4xf32> to vector<4x1xf32>
    %112 = arith.addf %109, %111 : vector<4x1xf32>
    %cst_44 = arith.constant 0.001953125 : f32
    %113 = vector.broadcast %cst_44 : f32 to vector<4x1xf32>
    %114 = arith.mulf %112, %113 : vector<4x1xf32>
    %115 = vector.broadcast %114 : vector<4x1xf32> to vector<4x128xf32>
    %116 = arith.subf %84, %115 : vector<4x128xf32>
    %117 = vector.broadcast %114 : vector<4x1xf32> to vector<4x128xf32>
    %118 = arith.subf %89, %117 : vector<4x128xf32>
    %119 = vector.broadcast %114 : vector<4x1xf32> to vector<4x128xf32>
    %120 = arith.subf %94, %119 : vector<4x128xf32>
    %121 = vector.broadcast %114 : vector<4x1xf32> to vector<4x128xf32>
    %122 = arith.subf %99, %121 : vector<4x128xf32>
    %123 = arith.mulf %116, %116 : vector<4x128xf32>
    %cst_45 = arith.constant dense<0.000000e+00> : vector<4xf32>
    %124 = vector.multi_reduction <add>, %123, %cst_45 [1] : vector<4x128xf32> to vector<4xf32>
    %125 = vector.shape_cast %124 : vector<4xf32> to vector<4x1xf32>
    %cst_46 = arith.constant 0.000000e+00 : f32
    %126 = vector.broadcast %cst_46 : f32 to vector<4x1xf32>
    %127 = arith.addf %126, %125 : vector<4x1xf32>
    %128 = arith.mulf %118, %118 : vector<4x128xf32>
    %cst_47 = arith.constant dense<0.000000e+00> : vector<4xf32>
    %129 = vector.multi_reduction <add>, %128, %cst_47 [1] : vector<4x128xf32> to vector<4xf32>
    %130 = vector.shape_cast %129 : vector<4xf32> to vector<4x1xf32>
    %131 = arith.addf %127, %130 : vector<4x1xf32>
    %132 = arith.mulf %120, %120 : vector<4x128xf32>
    %cst_48 = arith.constant dense<0.000000e+00> : vector<4xf32>
    %133 = vector.multi_reduction <add>, %132, %cst_48 [1] : vector<4x128xf32> to vector<4xf32>
    %134 = vector.shape_cast %133 : vector<4xf32> to vector<4x1xf32>
    %135 = arith.addf %131, %134 : vector<4x1xf32>
    %136 = arith.mulf %122, %122 : vector<4x128xf32>
    %cst_49 = arith.constant dense<0.000000e+00> : vector<4xf32>
    %137 = vector.multi_reduction <add>, %136, %cst_49 [1] : vector<4x128xf32> to vector<4xf32>
    %138 = vector.shape_cast %137 : vector<4xf32> to vector<4x1xf32>
    %139 = arith.addf %135, %138 : vector<4x1xf32>
    %cst_50 = arith.constant 0.001953125 : f32
    %140 = vector.broadcast %cst_50 : f32 to vector<4x1xf32>
    %141 = arith.mulf %139, %140 : vector<4x1xf32>
    %c0_51 = arith.constant 0 : index
    %c0_52 = arith.constant 0 : index
    %142 = vector.load %arg4[%c0_51, %c0_52] : memref<4x1xf32, #tpu.memory_space<vmem>>, vector<4x1xf32>
    %cst_53 = arith.constant 9.99999974E-6 : f32
    %143 = vector.broadcast %cst_53 : f32 to vector<4x1xf32>
    %144 = arith.addf %141, %143 : vector<4x1xf32>
    %145 = math.rsqrt %144 : vector<4x1xf32>
    %146 = arith.mulf %142, %145 : vector<4x1xf32>
    %c0_54 = arith.constant 0 : index
    %c0_55 = arith.constant 0 : index
    %147 = vector.load %arg5[%c0_54, %c0_55] : memref<4x1xf32, #tpu.memory_space<vmem>>, vector<4x1xf32>
    %148 = vector.broadcast %146 : vector<4x1xf32> to vector<4x128xf32>
    %149 = arith.mulf %116, %148 : vector<4x128xf32>
    %150 = vector.broadcast %147 : vector<4x1xf32> to vector<4x128xf32>
    %151 = arith.addf %149, %150 : vector<4x128xf32>
    %152 = vector.broadcast %146 : vector<4x1xf32> to vector<4x128xf32>
    %153 = arith.mulf %118, %152 : vector<4x128xf32>
    %154 = vector.broadcast %147 : vector<4x1xf32> to vector<4x128xf32>
    %155 = arith.addf %153, %154 : vector<4x128xf32>
    %156 = vector.broadcast %146 : vector<4x1xf32> to vector<4x128xf32>
    %157 = arith.mulf %120, %156 : vector<4x128xf32>
    %158 = vector.broadcast %147 : vector<4x1xf32> to vector<4x128xf32>
    %159 = arith.addf %157, %158 : vector<4x128xf32>
    %160 = vector.broadcast %146 : vector<4x1xf32> to vector<4x128xf32>
    %161 = arith.mulf %122, %160 : vector<4x128xf32>
    %162 = vector.broadcast %147 : vector<4x1xf32> to vector<4x128xf32>
    %163 = arith.addf %161, %162 : vector<4x128xf32>
    %164 = tpu.concatenate %151, %155, %159, %163 in 0 : vector<4x128xf32>, vector<4x128xf32>, vector<4x128xf32>, vector<4x128xf32> -> vector<16x128xf32>
    %c0_56 = arith.constant 0 : index
    %c0_57 = arith.constant 0 : index
    %165 = vector.load %arg6[%c0_56, %c0_57] : memref<16x128xf32, #tpu.memory_space<vmem>>, vector<16x128xf32>
    tpu.vector_store %arg6[%c0_56, %c0_57], %164 {strides = array<i32>} : memref<16x128xf32, #tpu.memory_space<vmem>>, vector<16x128xf32>,
    return
  }
  func.func @transform_0(%arg0: i32) -> (i32, i32) {
    %c0_i32 = arith.constant 0 : i32
    %c0_i32_0 = arith.constant 0 : i32
    %c0_i32_1 = arith.constant 0 : i32
    return %c0_i32, %c0_i32_0 : i32, i32
  }
  func.func @transform_1(%arg0: i32) -> (i32, i32) {
    %c0_i32 = arith.constant 0 : i32
    %c0_i32_0 = arith.constant 0 : i32
    %c0_i32_1 = arith.constant 0 : i32
    return %c0_i32, %c0_i32_0 : i32, i32
  }
  func.func @transform_2(%arg0: i32) -> (i32, i32, i32) {
    %c0_i32 = arith.constant 0 : i32
    %c0_i32_0 = arith.constant 0 : i32
    %c0_i32_1 = arith.constant 0 : i32
    %c0_i32_2 = arith.constant 0 : i32
    return %c0_i32, %c0_i32_0, %c0_i32_1 : i32, i32, i32
  }
  func.func @transform_3(%arg0: i32) -> (i32, i32) {
    %c0_i32 = arith.constant 0 : i32
    %c0_i32_0 = arith.constant 0 : i32
    %c0_i32_1 = arith.constant 0 : i32
    return %c0_i32, %c0_i32_0 : i32, i32
  }
  func.func @transform_4(%arg0: i32) -> (i32, i32) {
    %c0_i32 = arith.constant 0 : i32
    %c0_i32_0 = arith.constant 0 : i32
    %c0_i32_1 = arith.constant 0 : i32
    return %c0_i32, %c0_i32_0 : i32, i32
  }
  func.func @transform_5(%arg0: i32) -> (i32, i32) {
    %c0_i32 = arith.constant 0 : i32
    %c0_i32_0 = arith.constant 0 : i32
    %c0_i32_1 = arith.constant 0 : i32
    return %c0_i32, %c0_i32_0 : i32, i32
  }
}

</mosaic_0001>

<bundles_post_ra>
// kernel: unet_innermost_block.1
= control target key start
LH: loop header
LB: loop body
LE: loop exit
PB: predicated region body
PF: predicated region fallthrough
CT: control target
= control target key end

     0   :  { %v535_v0 = vmov 0.0   ;;  %vm536_vm0 = vmmov 0   ;;  %vm54_vm1 = vcmask 523264   ;;  %s537_s28 = smov 1   ;;  %s540_s29 = smov 8   ;;  %v99_v11 = vlaneseq  ;;  %s702_s0 = inlined_call_operand.vmem [shape: bf16[64,128], index: 0, kind: input, shape index: {}]   ;;  %s703_s1 = inlined_call_operand.vmem [shape: bf16[8,64], index: 1, kind: input, shape index: {}]   ;;  %s704_s2 = inlined_call_operand.vmem [shape: bf16[4,4,32], index: 2, kind: input, shape index: {}]   ;;  %s705_s4 = inlined_call_operand.vmem [shape: f32[4,1], index: 4, kind: input, shape index: {}]   ;;  %s706_s3 = inlined_call_operand.vmem [shape: f32[4,1], index: 3, kind: input, shape index: {}]   ;;  %s707_s5 = inlined_call_operand.vmem [shape: f32[16,128], index: 5, kind: output, shape index: {}]  }
   0x1   :  { %471 = vmatprep.subr.bf16.mxu0 %v535_v0  ;;  %v529_v1 = vld [vmem:[%s702_s0 + $0x18] sm:$0xff]   ;;  %479 = vmatprep.mubr.msk.bf16.mxu0 %vm536_vm0, %v535_v0  ;;  %v530_v2 = vld [vmem:[%s702_s0 + $0x10] sm:$0xff]   ;;  %v531_v3 = vld [vmem:[%s702_s0 + $0x8] sm:$0xff]   ;;  %s541_s30 = smov 121   ;;  %s542_s6 = smov 127   ;;  %vm545_vm4 = vmmov 1  }
   0x2   :  { %483 = vmatprep.subr.bf16.mxu1 %v535_v0  ;;  %487 = vmatprep.mubr.msk.bf16.mxu1 %vm536_vm0, %v535_v0  ;;  %v532_v4 = vld [vmem:[%s702_s0] sm:$0xff]   ;;  %s538_s0 = smov 9   ;;  %s543_s7 = smov 119   ;;  %v100_v12 = vand.u32 127, %v99_v11  ;;  %vm155_vm12 = vcmask 261120  }
   0x3   :  { %472 = vmatpush3.bf16.msra.mxu0 %v529_v1  ;;  %v21_v5 = vld [vmem:[%s703_s1] sm:$0xf]  ;;  %s539_s1 = smov 7   ;;  %s544_s8 = smov 120   ;;  %v438_v31 = vld [vmem:[%s704_s2 + $0x4] sm:$0x3] }
   0x4   :  { %473 = vmatprep.subr.bf16.mxu0 %v535_v0  ;;  %v102_v13 = vshra.s32 %v100_v12, 3  ;;  %v101_v14 = vand.u32 7, %v100_v12  ;;  %v154_v26 = vld [vmem:[%s704_s2] sm:$0x3]  ;;  %v430_v33 = vld [vmem:[%s704_s2 + $0x2] sm:$0x3] }
   0x5   :  { %v446_v36 = vld [vmem:[%s704_s2 + $0x6] sm:$0x3] }
   0x6   :  { %v103_v15 = vand.u32 7, %v102_v13  ;;  %vm614_vm2 = vcmp.ge.s32.totalorder %v101_v14, 1  ;;  %vm633_vm8 = vcmp.lt.s32.totalorder %v101_v14, 7  ;;  %v546_v13 = vmov 0   ;;  %v385_v14 = vld [vmem:[%s705_s4] sm:$0xf] }
   0x7   :  { %474 = vmatpush3.bf16.msra.mxu0 %v530_v2  ;;  %vm621_vm5 = vmpackc.low %vm614_vm2, %vm545_vm4  ;;  %527 = vset.pattern.permute.xlu1 %v546_v13 }
   0x8   :  { %475 = vmatprep.subr.bf16.mxu0 %v535_v0  ;;  %vm106_vm3 = vcmp.ge.s32.totalorder %v103_v15, 1  ;;  %vm136_vm9 = vcmp.lt.s32.totalorder %v103_v15, 7  ;;  %vm434_vm15 = vmpackc.low %vm545_vm4, %vm633_vm8  ;;  %528 = vset.pattern.permute.xlu0 %v546_v13 }
   0x9   :  { %vm108_vm6 = vmand %vm106_vm3, %vm614_vm2 }
   0xa   :  { %vm423_vm7 = vmpackc.low %vm108_vm6, %vm106_vm3 }
   0xb   :  { %476 = vmatpush3.bf16.msra.mxu0 %v531_v3  ;;  %vm120_vm10 = vmand %vm106_vm3, %vm633_vm8 }
   0xc   :  { %477 = vmatprep.subr.bf16.mxu0 %v535_v0  ;;  %vm137_vm11 = vmand %vm136_vm9, %vm614_vm2 }
   0xd   :  { %vm431_vm13 = vmpackc.low %vm106_vm3, %vm120_vm10  ;;  %vm338_vm3 = vcmask 1043456  }
   0xe   :  { %vm442_vm14 = vmpackc.low %vm137_vm11, %vm136_vm9 }
   0xf   :  { %478 = vmatpush3.bf16.msra.mxu0 %v532_v4 }
  0x10   :  { %499 = vmatprep.subr.bf16.mxu0 %v535_v0 }
  0x12   :  { %480 = vmatmul.mubr.msk.bf16.vlgmr.msra.gmra.mxu0 %vm54_vm1, %v21_v5  ;;  %vm148_vm1 = vmand %vm136_vm9, %vm633_vm8 }
  0x13   :  { %503 = vmatprep.mubr.msk.bf16.mxu0 %vm536_vm0, %v535_v0  ;;  %vm450_vm2 = vmpackc.low %vm136_vm9, %vm148_vm1 }
  0xd2   :  { %v92_v6 = vpop.f32.mrf.mxu0 }
  0xd3   :  { %v604_v7 = vmax.f32 %v92_v6, 0.0 }
  0xd4   :  { %v481_v8 = vpop.f32.mrf.mxu0 }
  0xd5   :  { %124 = vrot.lane.b32.xlu1 %v604_v7, %s537_s28  ;;  %104 = vrot.lane.b32.xlu0 %v604_v7, %s538_s0 }
  0xd6   :  { %v95_v9 = vpop.f32.mrf.mxu0 }
  0xd8   :  { %v482_v10 = vpop.f32.mrf.mxu0 }
  0xd9   :  { %117 = vrot.lane.b32.xlu1 %v604_v7, %s539_s1  ;;  %112 = vrot.lane.b32.xlu0 %v604_v7, %s540_s29 }
  0xdd   :  { %134 = vrot.lane.b32.xlu1 %v604_v7, %s541_s30  ;;  %129 = vrot.lane.b32.xlu0 %v604_v7, %s542_s6 }
  0xe1   :  { %146 = vrot.lane.b32.xlu1 %v604_v7, %s543_s7  ;;  %141 = vrot.lane.b32.xlu0 %v604_v7, %s544_s8 }
 0x147   :  { %v125_v17 = vpop.permute.xlu1 %124  ;;  %v105_v18 = vpop.permute.xlu0 %104 }
 0x148   :  { %v427_v20 = vpack.c.bf16 %v125_v17, %v604_v7 }
 0x14a   :  { %500 = vmatpush3.bf16.msk.msra.mxu0 %vm621_vm5, %v427_v20 }
 0x14b   :  { %v113_v21 = vpop.permute.xlu0 %112  ;;  %501 = vmatprep.subr.bf16.mxu0 %v535_v0  ;;  %v118_v24 = vpop.permute.xlu1 %117 }
 0x14c   :  { %v424_v22 = vpack.c.bf16 %v105_v18, %v113_v21  ;;  %v432_v29 = vpack.c.bf16 %v113_v21, %v118_v24  ;;  %v381_v24 = vld [vmem:[%s706_s3] sm:$0xf] }
 0x14e   :  { %484 = vmatpush3.bf16.msk.msra.mxu1 %vm423_vm7, %v424_v22 }
 0x14f   :  { %v130_v25 = vpop.permute.xlu0 %129  ;;  %485 = vmatprep.subr.bf16.mxu1 %v535_v0  ;;  %v135_v27 = vpop.permute.xlu1 %134 }
 0x150   :  { %v435_v32 = vpack.c.bf16 %v604_v7, %v130_v25 }
 0x152   :  { %486 = vmatpush3.bf16.msk.msra.mxu1 %vm621_vm5, %v427_v20 }
 0x153   :  { %v142_v28 = vpop.permute.xlu0 %141  ;;  %491 = vmatprep.subr.bf16.mxu1 %v535_v0  ;;  %v147_v34 = vpop.permute.xlu1 %146 }
 0x154   :  { %v443_v30 = vpack.c.bf16 %v135_v27, %v142_v28  ;;  %v451_v35 = vpack.c.bf16 %v142_v28, %v147_v34 }
 0x155   :  { %488 = vmatmul.mubr.msk.bf16.vlgmr.msra.gmra.mxu1 %vm155_vm12, %v154_v26 }
 0x156   :  { %492 = vmatpush3.bf16.msk.msra.mxu1 %vm431_vm13, %v432_v29  ;;  %502 = vmatpush3.bf16.msk.msra.mxu0 %vm442_vm14, %v443_v30 }
 0x157   :  { %493 = vmatprep.subr.bf16.mxu1 %v535_v0  ;;  %495 = vmatprep.mubr.msk.bf16.mxu1 %vm536_vm0, %v535_v0 }
 0x159   :  { %504 = vmatmul.mubr.msk.bf16.vlgmr.msra.gmra.mxu0 %vm155_vm12, %v438_v31 }
 0x15a   :  { %494 = vmatpush3.bf16.msk.msra.mxu1 %vm434_vm15, %v435_v32 }
 0x15b   :  { %507 = vmatprep.subr.bf16.mxu1 %v535_v0 }
 0x15d   :  { %496 = vmatmul.mubr.msk.bf16.vlgmr.msra.gmra.mxu1 %vm155_vm12, %v430_v33 }
 0x15e   :  { %508 = vmatpush3.bf16.msk.msra.mxu1 %vm434_vm15, %v435_v32  ;;  %511 = vmatprep.mubr.msk.bf16.mxu1 %vm536_vm0, %v535_v0 }
 0x15f   :  { %509 = vmatprep.subr.bf16.mxu1 %v535_v0 }
 0x162   :  { %510 = vmatpush3.bf16.msk.msra.mxu1 %vm450_vm2, %v451_v35 }
 0x165   :  { %512 = vmatmul.mubr.msk.bf16.vlgmr.msra.gmra.mxu1 %vm155_vm12, %v446_v36 }
 0x215   :  { %v193_v37 = vpop.f32.mrf.mxu1 }
 0x216   :  { %v339_v38 = vsel %vm338_vm3, %v193_v37, 0.0 }
 0x217   :  { %v489_v39 = vpop.f32.mrf.mxu1  ;;  %340 = vadd.xlane.f32.xlu0 %v339_v38 }
 0x219   :  { %v196_v40 = vpop.f32.mrf.mxu1  ;;  %v286_v41 = vpop.f32.mrf.mxu0 }
 0x21a   :  { %v347_v42 = vsel %vm338_vm3, %v286_v41, 0.0 }
 0x21b   :  { %v490_v43 = vpop.f32.mrf.mxu1  ;;  %v505_v44 = vpop.f32.mrf.mxu0  ;;  %348 = vadd.xlane.f32.xlu0 %v347_v42 }
 0x21d   :  { %v240_v45 = vpop.f32.mrf.mxu1  ;;  %v289_v46 = vpop.f32.mrf.mxu0 }
 0x21e   :  { %v343_v47 = vsel %vm338_vm3, %v240_v45, 0.0 }
 0x21f   :  { %344 = vadd.xlane.f32.xlu1 %v343_v47  ;;  %v497_v48 = vpop.f32.mrf.mxu1  ;;  %v506_v49 = vpop.f32.mrf.mxu0 }
 0x221   :  { %v243_v50 = vpop.f32.mrf.mxu1 }
 0x223   :  { %v498_v51 = vpop.f32.mrf.mxu1 }
 0x225   :  { %v332_v52 = vpop.f32.mrf.mxu1 }
 0x226   :  { %v351_v53 = vsel %vm338_vm3, %v332_v52, 0.0 }
 0x227   :  { %v513_v54 = vpop.f32.mrf.mxu1  ;;  %352 = vadd.xlane.f32.xlu0 %v351_v53 }
 0x229   :  { %v335_v55 = vpop.f32.mrf.mxu1 }
 0x22b   :  { %v514_v56 = vpop.f32.mrf.mxu1 }
 0x2a0   :  { %v341_v57 = vpop.xlane.xlu0 %340 }
 0x2a4   :  { %v349_v60 = vpop.xlane.xlu0 %348 }
 0x2a8   :  { %v345_v58 = vpop.xlane.xlu1 %344 }
 0x2a9   :  { %v346_v59 = vadd.f32 %v345_v58, %v341_v57 }
 0x2ab   :  { %v350_v61 = vadd.f32 %v349_v60, %v346_v59 }
 0x2b0   :  { %v353_v62 = vpop.xlane.xlu0 %352 }
 0x2b1   :  { %v354_v63 = vadd.f32 %v353_v62, %v350_v61 }
 0x2b3   :  { %v355_v0 = vmul.f32 0.001953125, %v354_v63 }
 0x2b5   :  { %v357_v1 = vsub.f32 %v240_v45, %v355_v0  ;;  %v356_v2 = vsub.f32 %v193_v37, %v355_v0  ;;  %v359_v3 = vsub.f32 %v332_v52, %v355_v0  ;;  %v358_v4 = vsub.f32 %v286_v41, %v355_v0 }
 0x2b7   :  { %v365_v5 = vmul.f32 %v357_v1, %v357_v1  ;;  %v360_v6 = vmul.f32 %v356_v2, %v356_v2  ;;  %v375_v9 = vmul.f32 %v359_v3, %v359_v3  ;;  %v370_v10 = vmul.f32 %v358_v4, %v358_v4 }
 0x2b9   :  { %v366_v7 = vsel %vm338_vm3, %v365_v5, 0.0  ;;  %v361_v8 = vsel %vm338_vm3, %v360_v6, 0.0  ;;  %v376_v11 = vsel %vm338_vm3, %v375_v9, 0.0  ;;  %v371_v12 = vsel %vm338_vm3, %v370_v10, 0.0 }
 0x2ba   :  { %367 = vadd.xlane.f32.xlu0 %v366_v7  ;;  %362 = vadd.xlane.f32.xlu1 %v361_v8 }
 0x2be   :  { %377 = vadd.xlane.f32.xlu0 %v376_v11  ;;  %372 = vadd.xlane.f32.xlu1 %v371_v12 }
 0x2d4   :  { %394 = vperm.xlu0 %528, %v385_v14  }
 0x343   :  { %v368_v15 = vpop.xlane.xlu0 %367  ;;  %v363_v16 = vpop.xlane.xlu1 %362 }
 0x344   :  { %v369_v17 = vadd.f32 %v368_v15, %v363_v16 }
 0x347   :  { %v373_v18 = vpop.xlane.xlu1 %372  ;;  %v378_v20 = vpop.xlane.xlu0 %377 }
 0x348   :  { %v374_v19 = vadd.f32 %v373_v18, %v369_v17 }
 0x34a   :  { %v379_v21 = vadd.f32 %v378_v20, %v374_v19 }
 0x34c   :  { %v380_v22 = vmul.f32 0.001953125, %v379_v21 }
 0x34e   :  { %v382_v23 = vadd.f32 1e-05, %v380_v22 }
 0x34f   :  { %v395_v28 = vpop.permute.xlu0 %394 }
 0x350   :  { %533 = vrsqrt.f32 %v382_v23 }
 0x35d   :  { %v534_v25 = vpop.eup %533 }
 0x35e   :  { %v384_v26 = vmul.f32 %v534_v25, %v381_v24 }
 0x360   :  { %388 = vperm.xlu1 %527, %v384_v26  }
 0x3db   :  { %v389_v27 = vpop.permute.xlu1 %388 }
 0x3dc   :  { %v391_v29 = vmul.f32 %v389_v27, %v356_v2  ;;  %v398_v30 = vmul.f32 %v389_v27, %v357_v1  ;;  %v400_v31 = vmul.f32 %v389_v27, %v358_v4  ;;  %v402_v32 = vmul.f32 %v389_v27, %v359_v3 }
 0x3de   :  { %v399_v33 = vadd.f32 %v398_v30, %v395_v28  ;;  %v403_v34 = vadd.f32 %v402_v32, %v395_v28  ;;  %v397_v35 = vadd.f32 %v395_v28, %v391_v29  ;;  %v401_v36 = vadd.f32 %v400_v31, %v395_v28 }
 0x3e0   :  { %v405_v37 = vrot.slane %v399_v33, 4  ;;  %v408_v38 = vrot.slane %v403_v34, 4 }
 0x3e2   :  { %v410_v39 = vsel %vm338_vm3, %v397_v35, %v405_v37  ;;  %v411_v40 = vsel %vm338_vm3, %v401_v36, %v408_v38 }
 0x3e3   :  { %412 = vst [vmem:[%s707_s5] sm:$0xff] %v410_v39  ;;  %413 = vst [vmem:[%s707_s5 + $0x8] sm:$0xff] %v411_v40 }

</bundles_post_ra>
